<compile_context>
chip_gen: v7x
topology: tpu7x:2x2x1
jax: 0.10.0
libtpu: 0.0.40
codegen_flags: <defaults>
</compile_context>

<pallas_src>
import jax
import jax.numpy as jnp
from jax.experimental import pallas as pl
from jax.experimental.pallas import tpu as pltpu  # noqa: F401  (TPU backend)

# ----------------------------- model dims -----------------------------------
B, S, H, FF, V = 2, 8, 32, 128, 64   # batch, seq, hidden, ffn, vocab
VP = 128                             # vocab padded to the 128-lane width
LN_EPS = 1e-5


# ----------------------------- Pallas kernel --------------------------------
def rfm_kernel(x_ref, wqkv_ref, wo_ref, w1_ref, w2_ref, wout_ref, ln_ref,
               o_ref):
    # x_ref:    (B*S, H)  f32 activations (batch fused into rows)
    # wqkv_ref: (3, H, H) bf16  [wq (pre-scaled by 1/sqrt(H)), wk, wv]
    # wo_ref:   (H, H)    bf16
    # w1_ref:   (H, FF)   bf16
    # w2_ref:   (FF, H)   bf16
    # wout_ref: (H, VP)   bf16  (zero-padded past V)
    # ln_ref:   (4, H)    f32   [ln1_g, ln1_b, ln2_g, ln2_b]
    # o_ref:    (B*S, VP) f32   lane-dense logits
    x = x_ref[...]                                            # (B*S, H) f32

    ln = ln_ref[...]
    ln1_g, ln1_b = ln[0:1, :], ln[1:2, :]
    ln2_g, ln2_b = ln[2:3, :], ln[3:4, :]

    # ---- pre-LN 1 (f32 elementwise) ----
    mu = jnp.mean(x, axis=-1, keepdims=True)
    var = jnp.mean((x - mu) * (x - mu), axis=-1, keepdims=True)
    xn = (x - mu) * jax.lax.rsqrt(var + LN_EPS)
    xn = xn * ln1_g + ln1_b                                   # (B*S, H)
    xn_b = xn.astype(jnp.bfloat16)

    # ---- QKV projections: leading-axis weight indexing (no lane slicing) ----
    q = jnp.dot(xn_b, wqkv_ref[0], preferred_element_type=jnp.float32)
    k = jnp.dot(xn_b, wqkv_ref[1], preferred_element_type=jnp.float32)
    v = jnp.dot(xn_b, wqkv_ref[2], preferred_element_type=jnp.float32)

    # ---- batched single-head attention (B=2), no explicit transpose ----
    q3 = q.reshape(B, S, H).astype(jnp.bfloat16)
    k3 = k.reshape(B, S, H).astype(jnp.bfloat16)
    v3 = v.reshape(B, S, H).astype(jnp.bfloat16)

    scores = jnp.einsum('bqd,bkd->bqk', q3, k3,
                        preferred_element_type=jnp.float32)   # (B, S, S) f32
    m = jnp.max(scores, axis=-1, keepdims=True)
    p = jnp.exp(scores - m)
    denom = jnp.sum(p, axis=-1, keepdims=True)
    attn = p * pl.reciprocal(denom, approx=True)              # softmax (EUP)

    ctx = jnp.einsum('bqk,bkd->bqd', attn.astype(jnp.bfloat16), v3,
                     preferred_element_type=jnp.float32)      # (B, S, H)
    ctx2 = ctx.reshape(B * S, H).astype(jnp.bfloat16)
    attn_out = jnp.dot(ctx2, wo_ref[...],
                       preferred_element_type=jnp.float32)    # (B*S, H)
    h1 = x + attn_out                                         # residual

    # ---- pre-LN 2 + GELU FFN (f32 elementwise) ----
    mu2 = jnp.mean(h1, axis=-1, keepdims=True)
    var2 = jnp.mean((h1 - mu2) * (h1 - mu2), axis=-1, keepdims=True)
    hn = (h1 - mu2) * jax.lax.rsqrt(var2 + LN_EPS)
    hn = hn * ln2_g + ln2_b

    f = jnp.dot(hn.astype(jnp.bfloat16), w1_ref[...],
                preferred_element_type=jnp.float32)           # (B*S, FF)
    f = jax.nn.gelu(f)                                        # f32 VPU/EUP
    f = jnp.dot(f.astype(jnp.bfloat16), w2_ref[...],
                preferred_element_type=jnp.float32)           # (B*S, H)
    h2 = h1 + f                                               # residual

    # ---- vocab logits: lane-dense (VP = 128) store ----
    o_ref[...] = jnp.dot(h2.astype(jnp.bfloat16), wout_ref[...],
                         preferred_element_type=jnp.float32)  # (B*S, VP)


# ----------------------------- wrapper ---------------------------------------
def dfm_forward(x_emb, params):
    """x_emb: (B, S, H) float32 embedded batch -> logits (B, S, V) float32."""
    wqkv, wo, w1, w2, wout_p, ln = params
    x2d = x_emb.reshape(B * S, H)

    logits_p = pl.pallas_call(
        rfm_kernel,
        out_shape=jax.ShapeDtypeStruct((B * S, VP), jnp.float32),
    )(x2d, wqkv, wo, w1, w2, wout_p, ln)

    return logits_p.reshape(B, S, VP)[:, :, :V]


def init_params(key):
    ks = jax.random.split(key, 8)
    scale = 0.02
    wq = scale * jax.random.normal(ks[0], (H, H), jnp.float32)
    wk = scale * jax.random.normal(ks[1], (H, H), jnp.float32)
    wv = scale * jax.random.normal(ks[2], (H, H), jnp.float32)
    wq = wq * jnp.float32(1.0 / (H ** 0.5))       # fold attention scale into wq
    wqkv = jnp.stack([wq, wk, wv], axis=0).astype(jnp.bfloat16)      # (3,H,H)

    wo = (scale * jax.random.normal(ks[3], (H, H), jnp.float32)
          ).astype(jnp.bfloat16)
    w1 = (scale * jax.random.normal(ks[4], (H, FF), jnp.float32)
          ).astype(jnp.bfloat16)
    w2 = (scale * jax.random.normal(ks[5], (FF, H), jnp.float32)
          ).astype(jnp.bfloat16)

    wout = scale * jax.random.normal(ks[6], (H, V), jnp.float32)
    wout_p = (jnp.zeros((H, VP), jnp.float32).at[:, :V].set(wout)
              ).astype(jnp.bfloat16)                                 # (H, VP)

    ln = jnp.stack([jnp.ones(H, jnp.float32), jnp.zeros(H, jnp.float32),
                    jnp.ones(H, jnp.float32), jnp.zeros(H, jnp.float32)],
                   axis=0)                                           # (4, H)

    emb = scale * jax.random.normal(ks[7], (V, H), jnp.float32)
    pos = scale * jax.random.normal(jax.random.fold_in(key, 7), (S, H),
                                    jnp.float32)
    return (wqkv, wo, w1, w2, wout_p, ln), emb, pos


if __name__ == "__main__":
    key = jax.random.PRNGKey(0)
    params, emb_table, pos_emb = init_params(key)

    # `batch` in DFM.forward: integer token ids (B, S)
    tokens = jax.random.randint(jax.random.fold_in(key, 1), (B, S), 0, V,
                                dtype=jnp.int32)

    # glue: embedding lookup + positional embedding (gather, not a hot path)
    x_emb = jnp.take(emb_table, tokens, axis=0) + pos_emb[None, :, :]  # (B,S,H)

    logits = dfm_forward(x_emb, params)
    jax.block_until_ready(logits)

    assert logits.shape == (B, S, V) and logits.dtype == jnp.float32
    assert bool(jnp.all(jnp.isfinite(logits)))
    print("KERNEL_OK")
</pallas_src>

<mosaic_0001>
module attributes {stable_mosaic.version = 11 : i64} {
  func.func @rfm_kernel(%arg0: memref<16x32xf32, #tpu.memory_space<vmem>>, %arg1: memref<3x32x32xbf16, #tpu.memory_space<vmem>>, %arg2: memref<32x32xbf16, #tpu.memory_space<vmem>>, %arg3: memref<32x128xbf16, #tpu.memory_space<vmem>>, %arg4: memref<128x32xbf16, #tpu.memory_space<vmem>>, %arg5: memref<32x128xbf16, #tpu.memory_space<vmem>>, %arg6: memref<4x32xf32, #tpu.memory_space<vmem>>, %arg7: memref<16x128xf32, #tpu.memory_space<vmem>>) attributes {dimension_semantics = [], scalar_prefetch = 0 : i64, scratch_operands = 0 : i64, tpu.core_type = #tpu.core_type<tc>} {
    %c0 = arith.constant 0 : index
    %c0_0 = arith.constant 0 : index
    %0 = vector.load %arg0[%c0, %c0_0] : memref<16x32xf32, #tpu.memory_space<vmem>>, vector<16x32xf32>
    %c0_1 = arith.constant 0 : index
    %c0_2 = arith.constant 0 : index
    %1 = vector.load %arg6[%c0_1, %c0_2] : memref<4x32xf32, #tpu.memory_space<vmem>>, vector<4x32xf32>
    %2 = vector.extract_strided_slice %1 {offsets = [0, 0], sizes = [1, 32], strides = [1, 1]} : vector<4x32xf32> to vector<1x32xf32>
    %3 = vector.extract_strided_slice %1 {offsets = [1, 0], sizes = [1, 32], strides = [1, 1]} : vector<4x32xf32> to vector<1x32xf32>
    %4 = vector.extract_strided_slice %1 {offsets = [2, 0], sizes = [1, 32], strides = [1, 1]} : vector<4x32xf32> to vector<1x32xf32>
    %5 = vector.extract_strided_slice %1 {offsets = [3, 0], sizes = [1, 32], strides = [1, 1]} : vector<4x32xf32> to vector<1x32xf32>
    %cst = arith.constant dense<0.000000e+00> : vector<16xf32>
    %6 = vector.multi_reduction <add>, %0, %cst [1] : vector<16x32xf32> to vector<16xf32>
    %7 = vector.shape_cast %6 : vector<16xf32> to vector<16x1xf32>
    %cst_3 = arith.constant 3.200000e+01 : f32
    %8 = vector.broadcast %cst_3 : f32 to vector<16x1xf32>
    %9 = arith.divf %7, %8 : vector<16x1xf32>
    %10 = vector.broadcast %9 : vector<16x1xf32> to vector<16x32xf32>
    %11 = arith.subf %0, %10 : vector<16x32xf32>
    %12 = vector.broadcast %9 : vector<16x1xf32> to vector<16x32xf32>
    %13 = arith.subf %0, %12 : vector<16x32xf32>
    %14 = arith.mulf %11, %13 : vector<16x32xf32>
    %cst_4 = arith.constant dense<0.000000e+00> : vector<16xf32>
    %15 = vector.multi_reduction <add>, %14, %cst_4 [1] : vector<16x32xf32> to vector<16xf32>
    %16 = vector.shape_cast %15 : vector<16xf32> to vector<16x1xf32>
    %cst_5 = arith.constant 3.200000e+01 : f32
    %17 = vector.broadcast %cst_5 : f32 to vector<16x1xf32>
    %18 = arith.divf %16, %17 : vector<16x1xf32>
    %19 = vector.broadcast %9 : vector<16x1xf32> to vector<16x32xf32>
    %20 = arith.subf %0, %19 : vector<16x32xf32>
    %cst_6 = arith.constant 9.99999974E-6 : f32
    %21 = vector.broadcast %cst_6 : f32 to vector<16x1xf32>
    %22 = arith.addf %18, %21 : vector<16x1xf32>
    %23 = math.rsqrt %22 : vector<16x1xf32>
    %24 = vector.broadcast %23 : vector<16x1xf32> to vector<16x32xf32>
    %25 = arith.mulf %20, %24 : vector<16x32xf32>
    %26 = vector.broadcast %2 : vector<1x32xf32> to vector<16x32xf32>
    %27 = arith.mulf %25, %26 : vector<16x32xf32>
    %28 = vector.broadcast %3 : vector<1x32xf32> to vector<16x32xf32>
    %29 = arith.addf %27, %28 : vector<16x32xf32>
    %30 = arith.truncf %29 : vector<16x32xf32> to vector<16x32xbf16>
    %c0_7 = arith.constant 0 : index
    %c0_8 = arith.constant 0 : index
    %c0_9 = arith.constant 0 : index
    %31 = vector.load %arg1[%c0_7, %c0_8, %c0_9] : memref<3x32x32xbf16, #tpu.memory_space<vmem>>, vector<1x32x32xbf16>
    %32 = vector.shape_cast %31 : vector<1x32x32xbf16> to vector<32x32xbf16>
    %cst_10 = arith.constant dense<0.000000e+00> : vector<16x32xf32>
    %33 = tpu.matmul %30, %32, %cst_10 {dimension_numbers = #tpu.dot_dimension_numbers<[1], [0], [0], [1], [0, 0, 1, 1], [], []>} : vector<16x32xbf16>, vector<32x32xbf16>, vector<16x32xf32> -> vector<16x32xf32>
    %c1 = arith.constant 1 : index
    %c0_11 = arith.constant 0 : index
    %c0_12 = arith.constant 0 : index
    %34 = vector.load %arg1[%c1, %c0_11, %c0_12] : memref<3x32x32xbf16, #tpu.memory_space<vmem>>, vector<1x32x32xbf16>
    %35 = vector.shape_cast %34 : vector<1x32x32xbf16> to vector<32x32xbf16>
    %cst_13 = arith.constant dense<0.000000e+00> : vector<16x32xf32>
    %36 = tpu.matmul %30, %35, %cst_13 {dimension_numbers = #tpu.dot_dimension_numbers<[1], [0], [0], [1], [0, 0, 1, 1], [], []>} : vector<16x32xbf16>, vector<32x32xbf16>, vector<16x32xf32> -> vector<16x32xf32>
    %c2 = arith.constant 2 : index
    %c0_14 = arith.constant 0 : index
    %c0_15 = arith.constant 0 : index
    %37 = vector.load %arg1[%c2, %c0_14, %c0_15] : memref<3x32x32xbf16, #tpu.memory_space<vmem>>, vector<1x32x32xbf16>
    %38 = vector.shape_cast %37 : vector<1x32x32xbf16> to vector<32x32xbf16>
    %cst_16 = arith.constant dense<0.000000e+00> : vector<16x32xf32>
    %39 = tpu.matmul %30, %38, %cst_16 {dimension_numbers = #tpu.dot_dimension_numbers<[1], [0], [0], [1], [0, 0, 1, 1], [], []>} : vector<16x32xbf16>, vector<32x32xbf16>, vector<16x32xf32> -> vector<16x32xf32>
    %40 = vector.shape_cast %33 : vector<16x32xf32> to vector<2x8x32xf32>
    %41 = arith.truncf %40 : vector<2x8x32xf32> to vector<2x8x32xbf16>
    %42 = vector.shape_cast %36 : vector<16x32xf32> to vector<2x8x32xf32>
    %43 = arith.truncf %42 : vector<2x8x32xf32> to vector<2x8x32xbf16>
    %44 = vector.shape_cast %39 : vector<16x32xf32> to vector<2x8x32xf32>
    %45 = arith.truncf %44 : vector<2x8x32xf32> to vector<2x8x32xbf16>
    "tpu.trace_start"() <{level = 10 : i32, message = "bqd,bkd->bqk"}> : () -> ()
    %cst_17 = arith.constant dense<0.000000e+00> : vector<2x8x8xf32>
    %46 = tpu.matmul %41, %43, %cst_17 {dimension_numbers = #tpu.dot_dimension_numbers<[2], [2], [1], [1], [0, 0, 0, 1, 1, 1], [0], [0]>} : vector<2x8x32xbf16>, vector<2x8x32xbf16>, vector<2x8x8xf32> -> vector<2x8x8xf32>
    "tpu.trace_stop"() : () -> ()
    %cst_18 = arith.constant dense<0xFF800000> : vector<2x8xf32>
    %47 = vector.multi_reduction <maximumf>, %46, %cst_18 [2] : vector<2x8x8xf32> to vector<2x8xf32>
    %48 = vector.shape_cast %47 : vector<2x8xf32> to vector<2x8x1xf32>
    %49 = vector.broadcast %48 : vector<2x8x1xf32> to vector<2x8x8xf32>
    %50 = arith.subf %46, %49 : vector<2x8x8xf32>
    %51 = math.exp %50 : vector<2x8x8xf32>
    %cst_19 = arith.constant dense<0.000000e+00> : vector<2x8xf32>
    %52 = vector.multi_reduction <add>, %51, %cst_19 [2] : vector<2x8x8xf32> to vector<2x8xf32>
    %53 = vector.shape_cast %52 : vector<2x8xf32> to vector<2x8x1xf32>
    %54 = tpu.reciprocal %53 {approx = true} : vector<2x8x1xf32> -> vector<2x8x1xf32>
    %55 = vector.broadcast %54 : vector<2x8x1xf32> to vector<2x8x8xf32>
    %56 = arith.mulf %51, %55 : vector<2x8x8xf32>
    %57 = arith.truncf %56 : vector<2x8x8xf32> to vector<2x8x8xbf16>
    "tpu.trace_start"() <{level = 10 : i32, message = "bqk,bkd->bqd"}> : () -> ()
    %cst_20 = arith.constant dense<0.000000e+00> : vector<2x8x32xf32>
    %58 = tpu.matmul %57, %45, %cst_20 {dimension_numbers = #tpu.dot_dimension_numbers<[2], [1], [1], [2], [0, 0, 0, 1, 1, 2], [0], [0]>} : vector<2x8x8xbf16>, vector<2x8x32xbf16>, vector<2x8x32xf32> -> vector<2x8x32xf32>
    "tpu.trace_stop"() : () -> ()
    %59 = vector.shape_cast %58 : vector<2x8x32xf32> to vector<16x32xf32>
    %60 = arith.truncf %59 : vector<16x32xf32> to vector<16x32xbf16>
    %c0_21 = arith.constant 0 : index
    %c0_22 = arith.constant 0 : index
    %61 = vector.load %arg2[%c0_21, %c0_22] : memref<32x32xbf16, #tpu.memory_space<vmem>>, vector<32x32xbf16>
    %cst_23 = arith.constant dense<0.000000e+00> : vector<16x32xf32>
    %62 = tpu.matmul %60, %61, %cst_23 {dimension_numbers = #tpu.dot_dimension_numbers<[1], [0], [0], [1], [0, 0, 1, 1], [], []>} : vector<16x32xbf16>, vector<32x32xbf16>, vector<16x32xf32> -> vector<16x32xf32>
    %63 = arith.addf %0, %62 : vector<16x32xf32>
    %cst_24 = arith.constant dense<0.000000e+00> : vector<16xf32>
    %64 = vector.multi_reduction <add>, %63, %cst_24 [1] : vector<16x32xf32> to vector<16xf32>
    %65 = vector.shape_cast %64 : vector<16xf32> to vector<16x1xf32>
    %cst_25 = arith.constant 3.200000e+01 : f32
    %66 = vector.broadcast %cst_25 : f32 to vector<16x1xf32>
    %67 = arith.divf %65, %66 : vector<16x1xf32>
    %68 = vector.broadcast %67 : vector<16x1xf32> to vector<16x32xf32>
    %69 = arith.subf %63, %68 : vector<16x32xf32>
    %70 = vector.broadcast %67 : vector<16x1xf32> to vector<16x32xf32>
    %71 = arith.subf %63, %70 : vector<16x32xf32>
    %72 = arith.mulf %69, %71 : vector<16x32xf32>
    %cst_26 = arith.constant dense<0.000000e+00> : vector<16xf32>
    %73 = vector.multi_reduction <add>, %72, %cst_26 [1] : vector<16x32xf32> to vector<16xf32>
    %74 = vector.shape_cast %73 : vector<16xf32> to vector<16x1xf32>
    %cst_27 = arith.constant 3.200000e+01 : f32
    %75 = vector.broadcast %cst_27 : f32 to vector<16x1xf32>
    %76 = arith.divf %74, %75 : vector<16x1xf32>
    %77 = vector.broadcast %67 : vector<16x1xf32> to vector<16x32xf32>
    %78 = arith.subf %63, %77 : vector<16x32xf32>
    %cst_28 = arith.constant 9.99999974E-6 : f32
    %79 = vector.broadcast %cst_28 : f32 to vector<16x1xf32>
    %80 = arith.addf %76, %79 : vector<16x1xf32>
    %81 = math.rsqrt %80 : vector<16x1xf32>
    %82 = vector.broadcast %81 : vector<16x1xf32> to vector<16x32xf32>
    %83 = arith.mulf %78, %82 : vector<16x32xf32>
    %84 = vector.broadcast %4 : vector<1x32xf32> to vector<16x32xf32>
    %85 = arith.mulf %83, %84 : vector<16x32xf32>
    %86 = vector.broadcast %5 : vector<1x32xf32> to vector<16x32xf32>
    %87 = arith.addf %85, %86 : vector<16x32xf32>
    %88 = arith.truncf %87 : vector<16x32xf32> to vector<16x32xbf16>
    %c0_29 = arith.constant 0 : index
    %c0_30 = arith.constant 0 : index
    %89 = vector.load %arg3[%c0_29, %c0_30] : memref<32x128xbf16, #tpu.memory_space<vmem>>, vector<32x128xbf16>
    %cst_31 = arith.constant dense<0.000000e+00> : vector<16x128xf32>
    %90 = tpu.matmul %88, %89, %cst_31 {dimension_numbers = #tpu.dot_dimension_numbers<[1], [0], [0], [1], [0, 0, 1, 1], [], []>} : vector<16x32xbf16>, vector<32x128xbf16>, vector<16x128xf32> -> vector<16x128xf32>
    %91 = arith.mulf %90, %90 : vector<16x128xf32>
    %92 = arith.mulf %90, %91 : vector<16x128xf32>
    %cst_32 = arith.constant 4.471500e-02 : f32
    %93 = vector.broadcast %cst_32 : f32 to vector<16x128xf32>
    %94 = arith.mulf %93, %92 : vector<16x128xf32>
    %95 = arith.addf %90, %94 : vector<16x128xf32>
    %cst_33 = arith.constant 0.797884583 : f32
    %96 = vector.broadcast %cst_33 : f32 to vector<16x128xf32>
    %97 = arith.mulf %96, %95 : vector<16x128xf32>
    %98 = math.tanh %97 : vector<16x128xf32>
    %cst_34 = arith.constant 1.000000e+00 : f32
    %99 = vector.broadcast %cst_34 : f32 to vector<16x128xf32>
    %100 = arith.addf %99, %98 : vector<16x128xf32>
    %cst_35 = arith.constant 5.000000e-01 : f32
    %101 = vector.broadcast %cst_35 : f32 to vector<16x128xf32>
    %102 = arith.mulf %101, %100 : vector<16x128xf32>
    %103 = arith.mulf %90, %102 : vector<16x128xf32>
    %104 = arith.truncf %103 : vector<16x128xf32> to vector<16x128xbf16>
    %c0_36 = arith.constant 0 : index
    %c0_37 = arith.constant 0 : index
    %105 = vector.load %arg4[%c0_36, %c0_37] : memref<128x32xbf16, #tpu.memory_space<vmem>>, vector<128x32xbf16>
    %cst_38 = arith.constant dense<0.000000e+00> : vector<16x32xf32>
    %106 = tpu.matmul %104, %105, %cst_38 {dimension_numbers = #tpu.dot_dimension_numbers<[1], [0], [0], [1], [0, 0, 1, 1], [], []>} : vector<16x128xbf16>, vector<128x32xbf16>, vector<16x32xf32> -> vector<16x32xf32>
    %107 = arith.addf %63, %106 : vector<16x32xf32>
    %108 = arith.truncf %107 : vector<16x32xf32> to vector<16x32xbf16>
    %c0_39 = arith.constant 0 : index
    %c0_40 = arith.constant 0 : index
    %109 = vector.load %arg5[%c0_39, %c0_40] : memref<32x128xbf16, #tpu.memory_space<vmem>>, vector<32x128xbf16>
    %cst_41 = arith.constant dense<0.000000e+00> : vector<16x128xf32>
    %110 = tpu.matmul %108, %109, %cst_41 {dimension_numbers = #tpu.dot_dimension_numbers<[1], [0], [0], [1], [0, 0, 1, 1], [], []>} : vector<16x32xbf16>, vector<32x128xbf16>, vector<16x128xf32> -> vector<16x128xf32>
    %c0_42 = arith.constant 0 : index
    %c0_43 = arith.constant 0 : index
    %111 = vector.load %arg7[%c0_42, %c0_43] : memref<16x128xf32, #tpu.memory_space<vmem>>, vector<16x128xf32>
    tpu.vector_store %arg7[%c0_42, %c0_43], %110 {strides = array<i32>} : memref<16x128xf32, #tpu.memory_space<vmem>>, vector<16x128xf32>,
    return
  }
}

</mosaic_0001>

<bundles_post_ra>
// kernel: tpu_custom_call.1
= control target key start
LH: loop header
LB: loop body
LE: loop exit
PB: predicated region body
PF: predicated region fallthrough
CT: control target
= control target key end

     0   :  { %12 = vsyncpa [#allocation3], 0  ;;  %s1344_s0 = inlined_call_operand.vmem [shape: f32[16,32], index: 0, kind: input, shape index: {}]   ;;  %s1345_s1 = inlined_call_operand.vmem [shape: bf16[3,32,32], index: 1, kind: input, shape index: {}]   ;;  %s1346_s2 = inlined_call_operand.vmem [shape: bf16[32,32], index: 2, kind: input, shape index: {}]   ;;  %s1347_s3 = inlined_call_operand.hbm [shape: bf16[32,128], index: 3, kind: input, shape index: {}]   ;;  %s1348_s4 = inlined_call_operand.vmem [shape: bf16[128,32], index: 4, kind: input, shape index: {}]   ;;  %s1349_s5 = inlined_call_operand.vmem [shape: bf16[32,128], index: 5, kind: input, shape index: {}]   ;;  %s1350_s6 = inlined_call_operand.vmem [shape: f32[4,32], index: 6, kind: input, shape index: {}]   ;;  %s1351_s7 = inlined_call_operand.hbm [shape: f32[16,128], index: 7, kind: output, shape index: {}]  }
   0x1   :  { %13 = vsyncpa [#allocation4], 0  ;;  %s1107_s24 = smov [#allocation2]   ;;  %s1059_s28 = scalar_lea.hbm %s1347_s3, 256 }
   0x2   :  { %s25_s25 = sshll.u32 %s1107_s24, 4  ;;  %p1060_p0 = scmp.ne.s32.totalorder %s1347_s3, %s1059_s28  ;;  %s26_s25 = int_to_ptr.vmem [resolvable:$true] %s25_s25 }
   0x3   :  { %p1063_p1 = scmp.lt.u32.totalorder %s1059_s28, %s1347_s3 }
   0x5   :  { %p1065_p2 = pnand %p1063_p1, %p1060_p0 }
   0x7   :  { %1068 = shalt.err (!%p1065_p2)
}
   0x8   :  { %s1069_s10 = scalar_lea.vmem %s26_s25, 256  ;;  %p1074_p4 = scmp.lt.s32.totalorder %s26_s25, %s26_s25 }
   0x9   :  { %p1070_p3 = scmp.ne.s32.totalorder %s26_s25, %s1069_s10  ;;  %p1075_p5 = scmp.lt.s32.totalorder %s1069_s10, %s1069_s10 }
   0xb   :  { %p1076_p6 = por %p1075_p5, %p1074_p4 }
   0xd   :  { %p1077_p7 = pnand %p1076_p6, %p1070_p3 }
   0xf   :  { %1080 = shalt.err (!%p1077_p7)
}
  0x10   :  { %s1108_s11 = smov 64   ;;  %s1109_s12 = smov 4  }
  0x11   :  { %31 = dma.hbm_to_vmem [thread:$0]  %s1347_s3, 256, %s26_s25, [#allocation3], %s1108_s11, %s1108_s11, %s1109_s12  }
  0x12   :  { %1103 = dma.done.wait [#allocation3], 256  }
  0x13   :  { %1104 = vsyncadd [#allocation3], 4294967040  ;;  %vm45_vm0 = vcmask 261120   ;;  %v1170_v0 = vld [vmem:[%s1344_s0] sm:$0xff]  ;;  %v1175_v1 = vld [vmem:[%s1344_s0 + $0x8] sm:$0xff]  ;;  %v1110_v15 = vmov 0.0   ;;  %v73_v21 = vlaneseq }
  0x14   :  { %v46_v2 = vsel %vm45_vm0, %v1170_v0, 0.0  ;;  %v49_v3 = vsel %vm45_vm0, %v1175_v1, 0.0  ;;  %v1019_v14 = vld [vmem:[%s1345_s1] sm:$0xff]   ;;  %919 = vmatprep.subr.bf16.mxu0 %v1110_v15  ;;  %943 = vmatprep.subr.bf16.mxu1 %v1110_v15  ;;  %v1020_v16 = vld [vmem:[%s1345_s1 + $0x8] sm:$0xff]   ;;  %vm1111_vm1 = vmmov 0   ;;  %v1021_v38 = vld [vmem:[%s1345_s1 + $0x10] sm:$0xff]  }
  0x15   :  { %47 = vadd.xlane.f32.xlu0 %v46_v2  ;;  %920 = vmatpush3.bf16.msra.mxu0 %v1019_v14  ;;  %v1199_v24 = vshrl.u32 %v73_v21, 7  ;;  %v1205_v26 = vld [vmem:[%s1350_s6] sm:$0xf]  ;;  %v1022_v40 = vld [vmem:[%s1345_s1 + $0x18] sm:$0xff]   ;;  %v1024_v42 = vld [vmem:[%s1345_s1 + $0x28] sm:$0xff]   ;;  %vm388_vm2 = vcmask 1043456  }
  0x16   :  { %923 = vmatprep.mubr.msk.bf16.mxu0 %vm1111_vm1, %v1110_v15  ;;  %921 = vmatprep.subr.bf16.mxu0 %v1110_v15  ;;  %v1023_v41 = vld [vmem:[%s1345_s1 + $0x20] sm:$0xff]   ;;  %vm360_vm3 = vcmask 64512   ;;  %s1112_s25 = smov [#allocation5]  }
  0x17   :  { %945 = vmatprep.mubr.msk.bf16.mxu1 %vm1111_vm1, %v1110_v15  ;;  %v75_v25 = vsub.s32 0, %v1199_v24  ;;  %v81_v30 = vsub.s32 1, %v1199_v24  ;;  %s834_s26 = sshll.u32 %s1112_s25, 4  ;;  %s835_s26 = int_to_ptr.vmem [resolvable:$true] %s834_s26 }
  0x18   :  { %p1086_p9 = scmp.lt.s32.totalorder %s835_s26, %s835_s26 }
  0x19   :  { %50 = vadd.xlane.f32.xlu0 %v49_v3  ;;  %922 = vmatpush3.bf16.msra.mxu0 %v1020_v16  ;;  %v76_v29 = vrot.slane %v1205_v26, %v75_v25  ;;  %v82_v34 = vrot.slane %v1205_v26, %v81_v30 }
  0x1a   :  { %927 = vmatprep.subr.bf16.mxu0 %v1110_v15 }
  0xa2   :  { %v48_v4 = vpop.xlane.xlu0 %47 }
  0xa3   :  { %v53_v5 = vmul.f32 0.03125, %v48_v4 }
  0xa5   :  { %v55_v6 = vsub.f32 %v1170_v0, %v53_v5 }
  0xa6   :  { %v51_v7 = vpop.xlane.xlu0 %50 }
  0xa7   :  { %v54_v8 = vmul.f32 0.03125, %v51_v7  ;;  %v57_v9 = vmul.f32 %v55_v6, %v55_v6 }
  0xa9   :  { %v56_v10 = vsub.f32 %v1175_v1, %v54_v8  ;;  %v59_v11 = vsel %vm45_vm0, %v57_v9, 0.0 }
  0xaa   :  { %60 = vadd.xlane.f32.xlu1 %v59_v11 }
  0xab   :  { %v58_v12 = vmul.f32 %v56_v10, %v56_v10 }
  0xad   :  { %v62_v13 = vsel %vm45_vm0, %v58_v12, 0.0 }
  0xae   :  { %63 = vadd.xlane.f32.xlu1 %v62_v13 }
 0x137   :  { %v61_v17 = vpop.xlane.xlu1 %60 }
 0x138   :  { %v65_v18 = vmul.f32 0.03125, %v61_v17 }
 0x13a   :  { %v67_v19 = vadd.f32 1e-05, %v65_v18 }
 0x13b   :  { %v64_v20 = vpop.xlane.xlu1 %63 }
 0x13c   :  { %1039 = vrsqrt.f32 %v67_v19  ;;  %v66_v22 = vmul.f32 0.03125, %v64_v20 }
 0x13e   :  { %v68_v23 = vadd.f32 1e-05, %v66_v22 }
 0x140   :  { %1041 = vrsqrt.f32 %v68_v23 }
 0x146   :  { %v1040_v27 = vpop.eup %1039 }
 0x147   :  { %v71_v28 = vmul.f32 %v1040_v27, %v55_v6 }
 0x149   :  { %v77_v33 = vmul.f32 %v76_v29, %v71_v28 }
 0x14a   :  { %v1042_v31 = vpop.eup %1041 }
 0x14b   :  { %v72_v32 = vmul.f32 %v1042_v31, %v56_v10  ;;  %v83_v36 = vadd.f32 %v82_v34, %v77_v33  ;;  %v1025_v31 = vld [vmem:[%s1346_s2] sm:$0xff]  }
 0x14d   :  { %v78_v35 = vmul.f32 %v76_v29, %v72_v32 }
 0x14f   :  { %v84_v37 = vadd.f32 %v82_v34, %v78_v35  ;;  %v1026_v35 = vld [vmem:[%s1346_s2 + $0x8] sm:$0xff]  }
 0x151   :  { %v85_v39 = vpack.c.bf16 %v84_v37, %v83_v36 }
 0x153   :  { %924 = vmatmul.mubr.msk.bf16.vlgmr.msra.gmra.mrb[0].mxu0 %vm45_vm0, %v85_v39 }
 0x154   :  { %928 = vmatpush3.bf16.msra.mxu0 %v1021_v38  ;;  %931 = vmatprep.mubr.msk.bf16.mxu0 %vm1111_vm1, %v1110_v15 }
 0x155   :  { %929 = vmatprep.subr.bf16.mxu0 %v1110_v15 }
 0x158   :  { %930 = vmatpush3.bf16.msra.mxu0 %v1022_v40 }
 0x159   :  { %935 = vmatprep.subr.bf16.mxu0 %v1110_v15 }
 0x15b   :  { %932 = vmatmul.mubr.msk.bf16.vlgmr.msra.gmra.mrb[4].mxu0 %vm45_vm0, %v85_v39 }
 0x15c   :  { %936 = vmatpush3.bf16.msra.mxu0 %v1023_v41  ;;  %939 = vmatprep.mubr.msk.bf16.mxu0 %vm1111_vm1, %v1110_v15 }
 0x15d   :  { %937 = vmatprep.subr.bf16.mxu0 %v1110_v15 }
 0x160   :  { %938 = vmatpush3.bf16.msra.mxu0 %v1024_v42 }
 0x161   :  { %949 = vmatprep.subr.bf16.mxu0 %v1110_v15 }
 0x163   :  { %940 = vmatmul.mubr.msk.bf16.vlgmr.msra.gmra.mrb[8].mxu0 %vm45_vm0, %v85_v39 }
 0x164   :  { %951 = vmatprep.mubr.msk.bf16.mxu0 %vm1111_vm1, %v1110_v15 }
 0x226   :  { %v139_v43 = vpop.f32.mrb[0].mxu0 }
 0x227   :  { %v925_v44 = vpop.f32.mrb[1].mxu0  ;;  %v262_v56 = vpack.c.bf16 %v139_v43, %v139_v43 }
 0x228   :  { %v142_v45 = vpop.f32.mrb[2].mxu0 }
 0x229   :  { %v926_v46 = vpop.f32.mrb[3].mxu0  ;;  %v263_v60 = vpack.c.bf16 %v142_v45, %v142_v45 }
 0x22e   :  { %v197_v47 = vpop.f32.mrb[4].mxu0 }
 0x22f   :  { %v264_v48 = vpack.c.bf16 %v197_v47, %v197_v47  ;;  %v933_v49 = vpop.f32.mrb[5].mxu0 }
 0x230   :  { %v200_v50 = vpop.f32.mrb[6].mxu0 }
 0x231   :  { %v265_v51 = vpack.c.bf16 %v200_v50, %v200_v50  ;;  %v934_v52 = vpop.f32.mrb[7].mxu0  ;;  %v272_v53 = vsel %vm45_vm0, %v264_v48, 0 }
 0x232   :  { %944 = vmatpush3.bf16.xpose.msra.mxu1 %v272_v53 }
 0x233   :  { %v318_v54 = vsel %vm45_vm0, %v265_v51, 0  ;;  %955 = vmatprep.subr.bf16.mxu1 %v1110_v15 }
 0x234   :  { %950 = vmatpush3.bf16.xpose.msra.mxu0 %v318_v54 }
 0x235   :  { %961 = vmatprep.subr.bf16.mxu0 %v1110_v15 }
 0x236   :  { %v255_v55 = vpop.f32.mrb[8].mxu0 }
 0x237   :  { %v266_v57 = vpack.c.bf16 %v255_v55, %v255_v55  ;;  %v941_v58 = vpop.f32.mrb[9].mxu0 }
 0x238   :  { %v258_v59 = vpop.f32.mrb[10].mxu0 }
 0x239   :  { %v390_v61 = vsel %vm388_vm2, %v266_v57, 0  ;;  %v267_v62 = vpack.c.bf16 %v258_v59, %v258_v59  ;;  %v942_v63 = vpop.f32.mrb[11].mxu0  ;;  %946 = vmatmul.mubr.msk.bf16.vlgmr.msra.gmra.mrb[0].mxu1 %vm45_vm0, %v262_v56 }
 0x23a   :  { %956 = vmatpush3.bf16.msra.mxu1 %v390_v61  ;;  %957 = vmatprep.mubr.msk.bf16.mxu1 %vm1111_vm1, %v1110_v15  ;;  %v1027_v61 = vld [vmem:[#allocation2] sm:$0xff]  }
 0x23b   :  { %v436_v2 = vsel %vm388_vm2, %v267_v62, 0  ;;  %952 = vmatmul.mubr.msk.bf16.vlgmr.msra.gmra.mrb[12].mxu0 %vm45_vm0, %v263_v60  ;;  %967 = vmatprep.subr.bf16.mxu1 %v1110_v15  ;;  %v1028_v62 = vld [vmem:[#allocation2 + $0x8] sm:$0xff]  }
 0x23c   :  { %962 = vmatpush3.bf16.msra.mxu0 %v436_v2  ;;  %963 = vmatprep.mubr.msk.bf16.mxu0 %vm1111_vm1, %v1110_v15 }
 0x23d   :  { %975 = vmatprep.subr.bf16.mxu0 %v1110_v15 }
 0x30c   :  { %v308_v3 = vpop.f32.mrb[0].mxu1 }
 0x30d   :  { %v947_v4 = vpop.f32.mrb[1].mxu1  ;;  %v361_v5 = vsel %vm360_vm3, %v308_v3, -inf }
 0x30e   :  { %362 = vmax.xlane.f32.xlu0 %v361_v5  ;;  %v311_v6 = vpop.f32.mrb[2].mxu1  ;;  %v354_v7 = vpop.f32.mrb[12].mxu0 }
 0x30f   :  { %v948_v8 = vpop.f32.mrb[3].mxu1  ;;  %v953_v9 = vpop.f32.mrb[13].mxu0  ;;  %v364_v10 = vsel %vm360_vm3, %v354_v7, -inf }
 0x310   :  { %365 = vmax.xlane.f32.xlu1 %v364_v10  ;;  %v357_v11 = vpop.f32.mrb[14].mxu0  ;;  %v575_v9 = vsub.s32 3, %v1199_v24 }
 0x311   :  { %v954_v12 = vpop.f32.mrb[15].mxu0 }
 0x39b   :  { %v363_v13 = vpop.xlane.xlu0 %362 }
 0x39c   :  { %v367_v14 = vsub.f32 %v308_v3, %v363_v13 }
 0x39d   :  { %v366_v16 = vpop.xlane.xlu1 %365 }
 0x39e   :  { %v369_v17 = vmul.f32 1.442695, %v367_v14  ;;  %v368_v18 = vsub.f32 %v354_v7, %v366_v16  ;;  %v569_v7 = vsub.s32 2, %v1199_v24  ;;  %v576_v16 = vrot.slane %v1205_v26, %v575_v9  ;;  %v1029_v24 = vld [vmem:[%s1348_s4] sm:$0xff]  }
 0x3a0   :  { %1043 = vpow2.f32 %v369_v17  ;;  %v371_v19 = vmul.f32 1.442695, %v368_v18  ;;  %v570_v8 = vrot.slane %v1205_v26, %v569_v7  ;;  %v1030_v26 = vld [vmem:[%s1348_s4 + $0x8] sm:$0xff]  }
 0x3a2   :  { %1045 = vpow2.f32 %v371_v19 }
 0x3aa   :  { %v1044_v20 = vpop.eup %1043 }
 0x3ab   :  { %v373_v21 = vsel %vm360_vm3, %v1044_v20, 0.0 }
 0x3ac   :  { %v1046_v22 = vpop.eup %1045  ;;  %374 = vadd.xlane.f32.xlu0 %v373_v21  ;;  %v1031_v21 = vld [vmem:[%s1348_s4 + $0x10] sm:$0xff]  }
 0x3ad   :  { %v376_v23 = vsel %vm360_vm3, %v1046_v22, 0.0 }
 0x3ae   :  { %377 = vadd.xlane.f32.xlu1 %v376_v23  ;;  %v1033_v23 = vld [vmem:[%s1348_s4 + $0x20] sm:$0xff]  }
 0x439   :  { %v375_v25 = vpop.xlane.xlu0 %374 }
 0x43a   :  { %1047 = vrcp.f32 %v375_v25  ;;  %v1034_v25 = vld [vmem:[%s1348_s4 + $0x28] sm:$0xff]  }
 0x43b   :  { %v378_v27 = vpop.xlane.xlu1 %377 }
 0x43c   :  { %1049 = vrcp.f32 %v378_v27  ;;  %v1035_v27 = vld [vmem:[%s1348_s4 + $0x30] sm:$0xff]  }
 0x444   :  { %v1048_v28 = vpop.eup %1047 }
 0x445   :  { %v381_v29 = vmul.f32 %v1048_v28, %v1044_v20  ;;  %v1036_v28 = vld [vmem:[%s1348_s4 + $0x38] sm:$0xff]  }
 0x446   :  { %v1050_v30 = vpop.eup %1049 }
 0x447   :  { %v382_v32 = vmul.f32 %v1050_v30, %v1046_v22  ;;  %v383_v33 = vpack.c.bf16 %v381_v29, %v381_v29  ;;  %v1032_v22 = vld [vmem:[%s1348_s4 + $0x18] sm:$0xff]  }
 0x449   :  { %958 = vmatmul.mubr.msk.bf16.vlgmr.msra.gmra.mrb[4].mxu1 %vm360_vm3, %v383_v33  ;;  %v384_v34 = vpack.c.bf16 %v382_v32, %v382_v32 }
 0x44a   :  { %968 = vmatpush3.bf16.msra.mxu1 %v1025_v31  ;;  %971 = vmatprep.mubr.msk.bf16.mxu1 %vm1111_vm1, %v1110_v15 }
 0x44b   :  { %964 = vmatmul.mubr.msk.bf16.vlgmr.msra.gmra.mrb[16].mxu0 %vm360_vm3, %v384_v34  ;;  %969 = vmatprep.subr.bf16.mxu1 %v1110_v15 }
 0x44c   :  { %979 = vmatprep.mubr.msk.bf16.mxu0 %vm1111_vm1, %v1110_v15  ;;  %976 = vmatpush3.bf16.msra.mxu0 %v1027_v61 }
 0x44d   :  { %977 = vmatprep.subr.bf16.mxu0 %v1110_v15 }
 0x44e   :  { %970 = vmatpush3.bf16.msra.mxu1 %v1026_v35 }
 0x44f   :  { %983 = vmatprep.subr.bf16.mxu1 %v1110_v15 }
 0x450   :  { %978 = vmatpush3.bf16.msra.mxu0 %v1028_v62 }
 0x451   :  { %1003 = vmatprep.subr.bf16.mxu0 %v1110_v15 }
 0x51c   :  { %v426_v36 = vpop.f32.mrb[4].mxu1 }
 0x51d   :  { %v959_v37 = vpop.f32.mrb[5].mxu1 }
 0x51e   :  { %v429_v38 = vpop.f32.mrb[6].mxu1  ;;  %v472_v39 = vpop.f32.mrb[16].mxu0 }
 0x51f   :  { %v478_v40 = vpack.c.bf16 %v472_v39, %v426_v36  ;;  %v960_v41 = vpop.f32.mrb[7].mxu1  ;;  %v965_v42 = vpop.f32.mrb[17].mxu0 }
 0x520   :  { %v475_v43 = vpop.f32.mrb[18].mxu0 }
 0x521   :  { %v966_v44 = vpop.f32.mrb[19].mxu0  ;;  %972 = vmatmul.mubr.msk.bf16.vlgmr.msra.gmra.mrb[8].mxu1 %vm45_vm0, %v478_v40 }
 0x522   :  { %999 = vmatprep.mubr.msk.bf16.mxu1 %vm1111_vm1, %v1110_v15  ;;  %984 = vmatpush3.bf16.msra.mxu1 %v1029_v24 }
 0x523   :  { %985 = vmatprep.subr.bf16.mxu1 %v1110_v15 }
 0x526   :  { %986 = vmatpush3.bf16.msra.mxu1 %v1030_v26 }
 0x527   :  { %987 = vmatprep.subr.bf16.mxu1 %v1110_v15 }
 0x52a   :  { %988 = vmatpush3.bf16.msra.mxu1 %v1031_v21 }
 0x52b   :  { %989 = vmatprep.subr.bf16.mxu1 %v1110_v15 }
 0x52e   :  { %990 = vmatpush3.bf16.msra.mxu1 %v1032_v22 }
 0x52f   :  { %991 = vmatprep.subr.bf16.mxu1 %v1110_v15 }
 0x532   :  { %992 = vmatpush3.bf16.msra.mxu1 %v1033_v23 }
 0x533   :  { %993 = vmatprep.subr.bf16.mxu1 %v1110_v15 }
 0x536   :  { %994 = vmatpush3.bf16.msra.mxu1 %v1034_v25 }
 0x537   :  { %995 = vmatprep.subr.bf16.mxu1 %v1110_v15 }
 0x53a   :  { %996 = vmatpush3.bf16.msra.mxu1 %v1035_v27 }
 0x53b   :  { %997 = vmatprep.subr.bf16.mxu1 %v1110_v15 }
 0x53e   :  { %998 = vmatpush3.bf16.msra.mxu1 %v1036_v28 }
 0x5f4   :  { %v532_v45 = vpop.f32.mrb[8].mxu1 }
 0x5f5   :  { %v1269_v46 = vadd.f32 %v532_v45, %v1170_v0  ;;  %v973_v47 = vpop.f32.mrb[9].mxu1 }
 0x5f6   :  { %v535_v48 = vpop.f32.mrb[10].mxu1 }
 0x5f7   :  { %v1272_v49 = vadd.f32 %v535_v48, %v1175_v1  ;;  %v974_v50 = vpop.f32.mrb[11].mxu1  ;;  %v541_v51 = vsel %vm45_vm0, %v1269_v46, 0.0 }
 0x5f8   :  { %542 = vadd.xlane.f32.xlu0 %v541_v51 }
 0x5f9   :  { %v544_v52 = vsel %vm45_vm0, %v1272_v49, 0.0 }
 0x5fa   :  { %545 = vadd.xlane.f32.xlu1 %v544_v52 }
 0x685   :  { %v543_v53 = vpop.xlane.xlu0 %542 }
 0x686   :  { %v547_v54 = vmul.f32 0.03125, %v543_v53 }
 0x687   :  { %v546_v55 = vpop.xlane.xlu1 %545 }
 0x688   :  { %v549_v0 = vsub.f32 %v1269_v46, %v547_v54  ;;  %v548_v56 = vmul.f32 0.03125, %v546_v55  ;;  %v1037_v54 = vld [vmem:[%s1349_s5] sm:$0xff]   ;;  %v1038_v55 = vld [vmem:[%s1349_s5 + $0x8] sm:$0xff]   ;;  %s1081_s5 = scalar_lea.vmem %s835_s26, 256 }
 0x689   :  { %p1082_p8 = scmp.ne.s32.totalorder %s835_s26, %s1081_s5  ;;  %p1087_p10 = scmp.lt.s32.totalorder %s1081_s5, %s1081_s5 }
 0x68a   :  { %v550_v57 = vsub.f32 %v1272_v49, %v548_v56  ;;  %v551_v58 = vmul.f32 %v549_v0, %v549_v0 }
 0x68b   :  { %p1088_p11 = por %p1087_p10, %p1086_p9 }
 0x68c   :  { %v553_v1 = vsel %vm45_vm0, %v551_v58, 0.0  ;;  %v552_v59 = vmul.f32 %v550_v57, %v550_v57 }
 0x68d   :  { %554 = vadd.xlane.f32.xlu0 %v553_v1  ;;  %p1089_p12 = pnand %p1088_p11, %p1082_p8 }
 0x68e   :  { %v556_v60 = vsel %vm45_vm0, %v552_v59, 0.0 }
 0x68f   :  { %557 = vadd.xlane.f32.xlu1 %v556_v60 }
 0x71a   :  { %v555_v63 = vpop.xlane.xlu0 %554 }
 0x71b   :  { %v559_v2 = vmul.f32 0.03125, %v555_v63 }
 0x71c   :  { %v558_v3 = vpop.xlane.xlu1 %557 }
 0x71d   :  { %v561_v4 = vadd.f32 1e-05, %v559_v2  ;;  %v560_v5 = vmul.f32 0.03125, %v558_v3 }
 0x71f   :  { %1051 = vrsqrt.f32 %v561_v4  ;;  %v562_v6 = vadd.f32 1e-05, %v560_v5 }
 0x721   :  { %1053 = vrsqrt.f32 %v562_v6 }
 0x729   :  { %v1052_v10 = vpop.eup %1051 }
 0x72a   :  { %v565_v11 = vmul.f32 %v1052_v10, %v549_v0 }
 0x72b   :  { %v1054_v12 = vpop.eup %1053 }
 0x72c   :  { %v571_v13 = vmul.f32 %v570_v8, %v565_v11  ;;  %v566_v14 = vmul.f32 %v1054_v12, %v550_v57 }
 0x72e   :  { %v572_v17 = vmul.f32 %v570_v8, %v566_v14  ;;  %v577_v18 = vadd.f32 %v576_v16, %v571_v13 }
 0x730   :  { %v578_v19 = vadd.f32 %v576_v16, %v572_v17 }
 0x732   :  { %v579_v20 = vpack.c.bf16 %v578_v19, %v577_v18 }
 0x734   :  { %980 = vmatmul.mubr.msk.bf16.vlgmr.msra.gmra.mrb[20].mxu0 %vm45_vm0, %v579_v20 }
 0x735   :  { %1007 = vmatprep.mubr.msk.bf16.mxu0 %vm1111_vm1, %v1110_v15  ;;  %1004 = vmatpush3.bf16.msra.mxu0 %v1037_v54 }
 0x736   :  { %1005 = vmatprep.subr.bf16.mxu0 %v1110_v15 }
 0x739   :  { %1006 = vmatpush3.bf16.msra.mxu0 %v1038_v55 }
 0x807   :  { %v633_v29 = vpop.f32.mrb[20].mxu0 }
 0x808   :  { %v640_v30 = vmul.f32 %v633_v29, %v633_v29  ;;  %v981_v31 = vpop.f32.mrb[21].mxu0 }
 0x809   :  { %v636_v32 = vpop.f32.mrb[22].mxu0 }
 0x80a   :  { %v642_v33 = vmul.f32 %v640_v30, %v633_v29  ;;  %v641_v34 = vmul.f32 %v636_v32, %v636_v32  ;;  %v982_v35 = vpop.f32.mrb[23].mxu0 }
 0x80c   :  { %v644_v36 = vmul.f32 0.044715, %v642_v33  ;;  %v643_v37 = vmul.f32 %v641_v34, %v636_v32 }
 0x80e   :  { %v646_v38 = vadd.f32 %v644_v36, %v633_v29  ;;  %v645_v39 = vmul.f32 0.044715, %v643_v37 }
 0x810   :  { %v648_v40 = vmul.f32 0.7978846, %v646_v38  ;;  %v647_v41 = vadd.f32 %v645_v39, %v636_v32 }
 0x812   :  { %1055 = vtanh.f32 %v648_v40  ;;  %v649_v42 = vmul.f32 0.7978846, %v647_v41 }
 0x814   :  { %1057 = vtanh.f32 %v649_v42 }
 0x81c   :  { %v1056_v43 = vpop.eup %1055 }
 0x81d   :  { %v652_v44 = vadd.f32 1.0, %v1056_v43 }
 0x81e   :  { %v1058_v45 = vpop.eup %1057 }
 0x81f   :  { %v654_v47 = vmul.f32 0.5, %v652_v44  ;;  %v653_v48 = vadd.f32 1.0, %v1058_v45 }
 0x821   :  { %v655_v50 = vmul.f32 0.5, %v653_v48  ;;  %v656_v51 = vmul.f32 %v654_v47, %v633_v29 }
 0x823   :  { %v657_v52 = vmul.f32 %v655_v50, %v636_v32 }
 0x825   :  { %v658_v53 = vpack.c.bf16 %v657_v52, %v656_v51 }
 0x827   :  { %1000 = vmatmul.mubr.bf16.vlgmr.msra.gmra.mrb[12].mxu1 %v658_v53 }
 0x8fa   :  { %v757_v0 = vpop.f32.mrb[12].mxu1 }
 0x8fb   :  { %v1001_v56 = vpop.f32.mrb[13].mxu1  ;;  %v764_v58 = vadd.f32 %v757_v0, %v1269_v46 }
 0x8fc   :  { %v760_v57 = vpop.f32.mrb[14].mxu1 }
 0x8fd   :  { %v765_v1 = vadd.f32 %v760_v57, %v1272_v49  ;;  %v1002_v59 = vpop.f32.mrb[15].mxu1 }
 0x8ff   :  { %v766_v60 = vpack.c.bf16 %v765_v1, %v764_v58 }
 0x901   :  { %1008 = vmatmul.mubr.msk.bf16.vlgmr.msra.gmra.mrb[24].mxu0 %vm45_vm0, %v766_v60 }
 0x9d4   :  { %v820_v61 = vpop.f32.mrb[24].mxu0 }
 0x9d5   :  { %827 = vst [vmem:[#allocation5] sm:$0xff] %v820_v61  ;;  %v1009_v15 = vpop.f32.mrb[25].mxu0 }
 0x9d6   :  { %v823_v62 = vpop.f32.mrb[26].mxu0 }
 0x9d7   :  { %828 = vst [vmem:[#allocation5 + $0x8] sm:$0xff] %v823_v62  ;;  %v1010_v63 = vpop.f32.mrb[27].mxu0 }
 0x9d8   :  { %1092 = shalt.err (!%p1089_p12)
}
 0x9d9   :  { %s1093_s29 = scalar_lea.hbm %s1351_s7, 256 }
 0x9da   :  { %p1094_p13 = scmp.ne.s32.totalorder %s1351_s7, %s1093_s29  ;;  %p1097_p0 = scmp.lt.u32.totalorder %s1093_s29, %s1351_s7 }
 0x9dc   :  { %p1099_p1 = pnand %p1097_p0, %p1094_p13 }
 0x9de   :  { %1102 = shalt.err (!%p1099_p1)
}
 0x9df   :  { %s1113_s2 = smov 128   ;;  %s1114_s10 = smov 8  }
 0x9e0   :  { %840 = dma.vmem_to_hbm [thread:$0]  %s835_s26, 256, %s1351_s7, [#allocation4], %s1113_s2, %s1113_s2, %s1114_s10  }
 0x9e1   :  { %1105 = dma.done.wait [#allocation4], 256  }
 0x9e2   :  { %1106 = vsyncadd [#allocation4], 4294967040 }
 0x9e3   :  { %844 = vsyncpa [#allocation3], 1 }
 0x9e4   :  { %845 = vsyncpa [#allocation4], 1 }

</bundles_post_ra>
